<compile_context>
chip_gen: v7x
topology: tpu7x:2x2x1
jax: 0.10.0
libtpu: 0.0.40
codegen_flags: <defaults>
</compile_context>

<pallas_src>
import jax
import jax.numpy as jnp
from jax.experimental import pallas as pl
from jax.experimental.pallas import tpu as pltpu


def _round_up(x, m):
    return (x + m - 1) // m * m


def vid2fmri_kernel(x_ref, w1_ref, b1_ref, w2_ref, b2_ref, o_ref):
    # x_ref : (TB, K)    f32 batch tile of the flattened sequence (mean folded
    #                    into w1, so no reduction happens in the kernel)
    # w1_ref: (K, Ep)    pre-tiled / pre-scaled / E-padded first weight
    # b1_ref: (1, Ep)    f32 bias (zero-padded)
    # w2_ref: (Ep, O)    second weight (zero-padded rows)
    # b2_ref: (1, O)     f32 bias
    # o_ref : (TB, O)    output tile (f32 or bf16)
    x = x_ref[...].astype(w1_ref.dtype)          # in-kernel cast (no-op if f32)
    h = jnp.dot(x, w1_ref[...], preferred_element_type=jnp.float32)
    # Bias add + tanh kept in f32 (v5e VPU/EUP have no bf16 path).
    h = jnp.tanh(h + b1_ref[...])
    out = jnp.dot(h.astype(w2_ref.dtype), w2_ref[...],
                  preferred_element_type=jnp.float32)
    o_ref[...] = (out + b2_ref[...]).astype(o_ref.dtype)


def vid2fmri_forward(x, w1, b1, w2, b2, *, block_b=1024, weight_dtype=None,
                     out_dtype=None, min_grid=1):
    """Forward pass of Vid2FMRIModel.

    x : (B, T, F)   input sequence (mean taken over T)
    w1: (F, E), b1: (1, E)   fc weights (stored (in, out))
    w2: (E, O), b2: (1, O)   final_embed weights
    block_b     : max batch tile.  The kernel is HBM-stream bound, so bigger
                  is better; ~tb*(K+O)*4*2 bytes of double-buffered stream +
                  ~weights must fit the scoped VMEM limit (comfortable up to
                  several thousand rows even on v7x's 64 MiB VMEM).
    weight_dtype: e.g. jnp.bfloat16 — weights only; x streams f32 and is cast
                  inside the kernel (avoids an extra wrapper pass over x).
    out_dtype   : e.g. jnp.bfloat16 to halve output HBM traffic.
    min_grid    : set to 2 on v7x with large B so the "parallel" batch axis
                  actually shards across both TensorCores.
    """
    B, T, F = x.shape
    E = w1.shape[-1]
    O = w2.shape[-1]
    K = T * F
    out_dtype = jnp.float32 if out_dtype is None else out_dtype

    # --- wrapper-side preprocessing (weights only; x is untouched) ----------
    # Fold the StatsModel mean over T into the first matmul:
    #   mean_t(x)[b, f] @ w1[f, e]  ==  x2d[b, t*F+f] @ (tile(w1,(T,1))/T)[.., e]
    x2d = x.reshape(B, K)                              # view-only reshape, no cast
    w1f = jnp.tile(w1, (T, 1)) * (1.0 / T)             # (K, E), 1/T pre-folded
    b1f = b1.reshape(1, E).astype(jnp.float32)
    b2f = b2.reshape(1, O).astype(jnp.float32)

    # Lane-dense hidden width: zero-pad E -> Ep (multiple of 128).  Padded h
    # columns are tanh(0)=0 and hit zero rows of w2, so the output is unchanged.
    Ep = _round_up(E, 128)
    if Ep != E:
        w1f = jnp.pad(w1f, ((0, 0), (0, Ep - E)))
        b1f = jnp.pad(b1f, ((0, 0), (0, Ep - E)))
        w2p = jnp.pad(w2, ((0, Ep - E), (0, 0)))
    else:
        w2p = w2

    if weight_dtype is not None:
        w1f = w1f.astype(weight_dtype)
        w2p = w2p.astype(weight_dtype)

    # --- batch tile selection -----------------------------------------------
    # Sublane packing: 16-row alignment if any 16-bit dtype is in play.
    has_16bit = (weight_dtype in (jnp.bfloat16, jnp.float16)
                 or out_dtype in (jnp.bfloat16, jnp.float16))
    align = 16 if has_16bit else 8

    tb = None
    if B % align == 0:
        # Largest aligned tile <= block_b (and <= B/min_grid) that divides B,
        # so no jnp.pad / out-slice passes over the big streams are needed.
        cap = max(align, min(block_b, B // max(min_grid, 1)))
        cand = (cap // align) * align
        while cand >= align:
            if B % cand == 0:
                tb = cand
                break
            cand -= align
    if tb is None:                                     # ragged batch fallback
        tb = _round_up(min(block_b, B), align)

    Bp = _round_up(B, tb)
    if Bp != B:
        x2d = jnp.pad(x2d, ((0, Bp - B), (0, 0)))
    grid = (Bp // tb,)

    flops = 2 * B * (K * Ep + Ep * O)
    bytes_accessed = (
        x2d.size * x2d.dtype.itemsize
        + w1f.size * w1f.dtype.itemsize
        + w2p.size * w2p.dtype.itemsize
        + (b1f.size + b2f.size) * 4
        + Bp * O * jnp.dtype(out_dtype).itemsize
    )

    out = pl.pallas_call(
        vid2fmri_kernel,
        out_shape=jax.ShapeDtypeStruct((Bp, O), out_dtype),
        grid_spec=pltpu.PrefetchScalarGridSpec(
            num_scalar_prefetch=0,
            grid=grid,
            in_specs=[
                pl.BlockSpec((tb, K), lambda i: (i, 0)),   # x stream (pipelined)
                pl.BlockSpec((K, Ep), lambda i: (0, 0)),   # w1 (VMEM-resident)
                pl.BlockSpec((1, Ep), lambda i: (0, 0)),   # b1
                pl.BlockSpec((Ep, O), lambda i: (0, 0)),   # w2
                pl.BlockSpec((1, O), lambda i: (0, 0)),    # b2
            ],
            out_specs=pl.BlockSpec((tb, O), lambda i: (i, 0)),
        ),
        compiler_params=pltpu.CompilerParams(
            dimension_semantics=("parallel",),             # megacore / v7x 2-TC
        ),
        cost_estimate=pl.CostEstimate(
            flops=flops,
            transcendentals=B * Ep,
            bytes_accessed=bytes_accessed,
        ),
    )(x2d, w1f, b1f, w2p, b2f)

    if Bp != B:
        out = out[:B]
    return out


if __name__ == "__main__":
    # Module hyper-params consistent with Vid2FMRIModel:
    #   num_of_features = 32, embed_size = 64, output_size = 128
    B, T, F = 128, 8, 32
    E, O = 64, 128

    key = jax.random.PRNGKey(0)
    k_x, k_w1, k_b1, k_w2, k_b2 = jax.random.split(key, 5)

    x = jax.random.normal(k_x, (B, T, F), dtype=jnp.float32)

    # Deterministic "synthetic" parameters (Linear-style init), stored (in, out).
    w1 = jax.random.uniform(k_w1, (F, E), minval=-1.0 / F**0.5,
                            maxval=1.0 / F**0.5, dtype=jnp.float32)
    b1 = jax.random.uniform(k_b1, (1, E), minval=-1.0 / F**0.5,
                            maxval=1.0 / F**0.5, dtype=jnp.float32)
    w2 = jax.random.uniform(k_w2, (E, O), minval=-1.0 / E**0.5,
                            maxval=1.0 / E**0.5, dtype=jnp.float32)
    b2 = jax.random.uniform(k_b2, (1, O), minval=-1.0 / E**0.5,
                            maxval=1.0 / E**0.5, dtype=jnp.float32)

    # Pure-JAX reference of the forward semantics.
    ref = jnp.tanh(jnp.mean(x, axis=1) @ w1 + b1) @ w2 + b2

    # f32 path: whole batch in a single grid step (tb=128, grid=(1,)), no
    # padding/cast passes over x.
    out = jax.block_until_ready(vid2fmri_forward(x, w1, b1, w2, b2))
    assert out.shape == (B, O)
    assert jnp.allclose(out, ref, atol=1e-5, rtol=1e-5), "f32 mismatch vs reference"

    # Multi-step grid (tb=64, grid=(2,)) — exercises the pipelined x stream /
    # v7x-style two-step parallel batch axis.  x still streams f32.
    out2 = jax.block_until_ready(vid2fmri_forward(x, w1, b1, w2, b2, min_grid=2))
    assert out2.shape == (B, O)
    assert jnp.allclose(out2, ref, atol=1e-5, rtol=1e-5), "grid=2 mismatch vs reference"

    # bf16-weight path: weights cast once in the wrapper, x streams f32 and is
    # cast inside the kernel right before the MXU dot; f32 accumulation and
    # f32 bias/tanh.
    out_bf16 = jax.block_until_ready(
        vid2fmri_forward(x, w1, b1, w2, b2, weight_dtype=jnp.bfloat16))
    assert out_bf16.shape == (B, O)
    assert jnp.allclose(out_bf16, ref, atol=3e-2, rtol=0.0), "bf16-weight mismatch"

    # bf16 output path (halves output HBM traffic when the consumer allows it).
    out_lo = jax.block_until_ready(
        vid2fmri_forward(x, w1, b1, w2, b2, out_dtype=jnp.bfloat16))
    assert out_lo.shape == (B, O) and out_lo.dtype == jnp.bfloat16
    assert jnp.allclose(out_lo.astype(jnp.float32), ref, atol=3e-2, rtol=0.0), \
        "bf16-output mismatch"

    print("KERNEL_OK")
</pallas_src>

<mosaic_0001>
module attributes {stable_mosaic.version = 11 : i64} {
  func.func @vid2fmri_kernel(%arg0: i32, %arg1: memref<128x256xf32, #tpu.memory_space<vmem>>, %arg2: memref<256x128xf32, #tpu.memory_space<vmem>>, %arg3: memref<1x128xf32, #tpu.memory_space<vmem>>, %arg4: memref<128x128xf32, #tpu.memory_space<vmem>>, %arg5: memref<1x128xf32, #tpu.memory_space<vmem>>, %arg6: memref<128x128xf32, #tpu.memory_space<vmem>>) attributes {dimension_semantics = [#tpu.dimension_semantics<parallel>], iteration_bounds = array<i64: 1>, scalar_prefetch = 0 : i64, scratch_operands = 0 : i64, tpu.core_type = #tpu.core_type<tc>, window_params = [{transform_indices = @transform_0, window_bounds = array<i64: 128, 256>}, {pipeline_mode = #tpu.pipeline_mode<synchronous>, transform_indices = @transform_1, window_bounds = array<i64: 256, 128>}, {pipeline_mode = #tpu.pipeline_mode<synchronous>, transform_indices = @transform_2, window_bounds = array<i64: 1, 128>}, {pipeline_mode = #tpu.pipeline_mode<synchronous>, transform_indices = @transform_3, window_bounds = array<i64: 128, 128>}, {pipeline_mode = #tpu.pipeline_mode<synchronous>, transform_indices = @transform_4, window_bounds = array<i64: 1, 128>}, {transform_indices = @transform_5, window_bounds = array<i64: 128, 128>}]} {
    %c0 = arith.constant 0 : index
    %c0_0 = arith.constant 0 : index
    %0 = vector.load %arg1[%c0, %c0_0] : memref<128x256xf32, #tpu.memory_space<vmem>>, vector<128x256xf32>
    %c0_1 = arith.constant 0 : index
    %c0_2 = arith.constant 0 : index
    %1 = vector.load %arg2[%c0_1, %c0_2] : memref<256x128xf32, #tpu.memory_space<vmem>>, vector<256x128xf32>
    %cst = arith.constant dense<0.000000e+00> : vector<128x128xf32>
    %2 = tpu.matmul %0, %1, %cst {dimension_numbers = #tpu.dot_dimension_numbers<[1], [0], [0], [1], [0, 0, 1, 1], [], []>} : vector<128x256xf32>, vector<256x128xf32>, vector<128x128xf32> -> vector<128x128xf32>
    %c0_3 = arith.constant 0 : index
    %c0_4 = arith.constant 0 : index
    %3 = vector.load %arg3[%c0_3, %c0_4] : memref<1x128xf32, #tpu.memory_space<vmem>>, vector<1x128xf32>
    %4 = vector.broadcast %3 : vector<1x128xf32> to vector<128x128xf32>
    %5 = arith.addf %2, %4 : vector<128x128xf32>
    %6 = math.tanh %5 : vector<128x128xf32>
    %c0_5 = arith.constant 0 : index
    %c0_6 = arith.constant 0 : index
    %7 = vector.load %arg4[%c0_5, %c0_6] : memref<128x128xf32, #tpu.memory_space<vmem>>, vector<128x128xf32>
    %cst_7 = arith.constant dense<0.000000e+00> : vector<128x128xf32>
    %8 = tpu.matmul %6, %7, %cst_7 {dimension_numbers = #tpu.dot_dimension_numbers<[1], [0], [0], [1], [0, 0, 1, 1], [], []>} : vector<128x128xf32>, vector<128x128xf32>, vector<128x128xf32> -> vector<128x128xf32>
    %c0_8 = arith.constant 0 : index
    %c0_9 = arith.constant 0 : index
    %9 = vector.load %arg5[%c0_8, %c0_9] : memref<1x128xf32, #tpu.memory_space<vmem>>, vector<1x128xf32>
    %10 = vector.broadcast %9 : vector<1x128xf32> to vector<128x128xf32>
    %11 = arith.addf %8, %10 : vector<128x128xf32>
    %c0_10 = arith.constant 0 : index
    %c0_11 = arith.constant 0 : index
    %12 = vector.load %arg6[%c0_10, %c0_11] : memref<128x128xf32, #tpu.memory_space<vmem>>, vector<128x128xf32>
    tpu.vector_store %arg6[%c0_10, %c0_11], %11 {strides = array<i32>} : memref<128x128xf32, #tpu.memory_space<vmem>>, vector<128x128xf32>,
    return
  }
  func.func @transform_0(%arg0: i32) -> (i32, i32) {
    %c0_i32 = arith.constant 0 : i32
    %c0_i32_0 = arith.constant 0 : i32
    return %arg0, %c0_i32 : i32, i32
  }
  func.func @transform_1(%arg0: i32) -> (i32, i32) {
    %c0_i32 = arith.constant 0 : i32
    %c0_i32_0 = arith.constant 0 : i32
    %c0_i32_1 = arith.constant 0 : i32
    return %c0_i32, %c0_i32_0 : i32, i32
  }
  func.func @transform_2(%arg0: i32) -> (i32, i32) {
    %c0_i32 = arith.constant 0 : i32
    %c0_i32_0 = arith.constant 0 : i32
    %c0_i32_1 = arith.constant 0 : i32
    return %c0_i32, %c0_i32_0 : i32, i32
  }
  func.func @transform_3(%arg0: i32) -> (i32, i32) {
    %c0_i32 = arith.constant 0 : i32
    %c0_i32_0 = arith.constant 0 : i32
    %c0_i32_1 = arith.constant 0 : i32
    return %c0_i32, %c0_i32_0 : i32, i32
  }
  func.func @transform_4(%arg0: i32) -> (i32, i32) {
    %c0_i32 = arith.constant 0 : i32
    %c0_i32_0 = arith.constant 0 : i32
    %c0_i32_1 = arith.constant 0 : i32
    return %c0_i32, %c0_i32_0 : i32, i32
  }
  func.func @transform_5(%arg0: i32) -> (i32, i32) {
    %c0_i32 = arith.constant 0 : i32
    %c0_i32_0 = arith.constant 0 : i32
    return %arg0, %c0_i32 : i32, i32
  }
}

</mosaic_0001>

<bundles_post_ra>
// kernel: tpu_custom_call.1
= control target key start
LH: loop header
LB: loop body
LE: loop exit
PB: predicated region body
PF: predicated region fallthrough
CT: control target
= control target key end

     0   :  { %10 = vsyncpa [#allocation3], 0  ;;  %s983_s0 = inlined_call_operand.hbm [shape: f32[128,256], index: 0, kind: input, shape index: {}]   ;;  %s984_s1 = inlined_call_operand.hbm [shape: f32[256,128], index: 1, kind: input, shape index: {}]   ;;  %s985_s2 = inlined_call_operand.vmem [shape: f32[1,128], index: 2, kind: input, shape index: {}]   ;;  %s986_s3 = inlined_call_operand.hbm [shape: f32[128,128], index: 3, kind: input, shape index: {}]   ;;  %s987_s4 = inlined_call_operand.vmem [shape: f32[1,128], index: 4, kind: input, shape index: {}]   ;;  %s988_s5 = inlined_call_operand.hbm [shape: f32[128,128], index: 5, kind: output, shape index: {}]  }
   0x1   :  { %11 = vsyncpa [#allocation6], 0 }
   0x2   :  { %12 = vsyncpa [#allocation4], 0  ;;  %s864_s18 = smov [#allocation5]   ;;  %s770_s22 = scalar_lea.hbm %s984_s1, 4096 }
   0x3   :  { %s30_s19 = sshll.u32 %s864_s18, 4  ;;  %p771_p0 = scmp.ne.s32.totalorder %s984_s1, %s770_s22  ;;  %s31_s19 = int_to_ptr.vmem [resolvable:$true] %s30_s19 }
   0x4   :  { %p774_p1 = scmp.lt.u32.totalorder %s770_s22, %s984_s1 }
   0x6   :  { %p776_p2 = pnand %p774_p1, %p771_p0 }
   0x8   :  { %779 = shalt.err (!%p776_p2)
}
   0x9   :  { %s780_s27 = scalar_lea.vmem %s31_s19, 4096  ;;  %p785_p4 = scmp.lt.s32.totalorder %s31_s19, %s31_s19 }
   0xa   :  { %p781_p3 = scmp.ne.s32.totalorder %s31_s19, %s780_s27  ;;  %p786_p5 = scmp.lt.s32.totalorder %s780_s27, %s780_s27 }
   0xc   :  { %p787_p6 = por %p786_p5, %p785_p4 }
   0xe   :  { %p788_p7 = pnand %p787_p6, %p781_p3 }
  0x10   :  { %791 = shalt.err (!%p788_p7)
}
  0x11   :  { %s865_s28 = smov 128   ;;  %s866_s29 = smov 8  }
  0x12   :  { %36 = dma.hbm_to_vmem [thread:$0]  %s984_s1, 4096, %s31_s19, [#allocation6], %s865_s28, %s865_s28, %s866_s29  }
  0x13   :  { %s867_s7 = smov [#allocation2]   ;;  %s792_s11 = scalar_lea.hbm %s983_s0, 4096 }
  0x14   :  { %s18_s8 = sshll.u32 %s867_s7, 4  ;;  %p793_p8 = scmp.ne.s32.totalorder %s983_s0, %s792_s11  ;;  %s19_s8 = int_to_ptr.vmem [resolvable:$true] %s18_s8 }
  0x15   :  { %p796_p9 = scmp.lt.u32.totalorder %s792_s11, %s983_s0 }
  0x17   :  { %p798_p10 = pnand %p796_p9, %p793_p8 }
  0x19   :  { %801 = shalt.err (!%p798_p10)
}
  0x1a   :  { %s802_s16 = scalar_lea.vmem %s19_s8, 4096  ;;  %p807_p12 = scmp.lt.s32.totalorder %s19_s8, %s19_s8 }
  0x1b   :  { %p803_p11 = scmp.ne.s32.totalorder %s19_s8, %s802_s16  ;;  %p808_p13 = scmp.lt.s32.totalorder %s802_s16, %s802_s16 }
  0x1d   :  { %p809_p0 = por %p808_p13, %p807_p12 }
  0x1f   :  { %p810_p1 = pnand %p809_p0, %p803_p11 }
  0x21   :  { %813 = shalt.err (!%p810_p1)
}
  0x22   :  { %s868_s1 = smov 256   ;;  %s869_s17 = smov 16  }
  0x23   :  { %24 = dma.hbm_to_vmem [thread:$0]  %s983_s0, 4096, %s19_s8, [#allocation3], %s868_s1, %s868_s1, %s869_s17  }
  0x24   :  { %s870_s20 = smov [#allocation7]   ;;  %s814_s24 = scalar_lea.hbm %s986_s3, 2048 }
  0x25   :  { %s44_s21 = sshll.u32 %s870_s20, 4  ;;  %p815_p2 = scmp.ne.s32.totalorder %s986_s3, %s814_s24  ;;  %s45_s21 = int_to_ptr.vmem [resolvable:$true] %s44_s21 }
  0x26   :  { %p818_p3 = scmp.lt.u32.totalorder %s814_s24, %s986_s3 }
  0x28   :  { %p820_p4 = pnand %p818_p3, %p815_p2 }
  0x2a   :  { %823 = shalt.err (!%p820_p4)
}
  0x2b   :  { %s824_s6 = scalar_lea.vmem %s45_s21, 2048  ;;  %p829_p6 = scmp.lt.s32.totalorder %s45_s21, %s45_s21 }
  0x2c   :  { %p825_p5 = scmp.ne.s32.totalorder %s45_s21, %s824_s6  ;;  %p830_p7 = scmp.lt.s32.totalorder %s824_s6, %s824_s6 }
  0x2e   :  { %p831_p8 = por %p830_p7, %p829_p6 }
  0x30   :  { %p832_p9 = pnand %p831_p8, %p825_p5 }
  0x32   :  { %835 = shalt.err (!%p832_p9)
}
  0x33   :  { %50 = dma.hbm_to_vmem [thread:$0]  %s986_s3, 2048, %s45_s21, [#allocation6], %s865_s28, %s865_s28, %s866_s29  }
  0x34   :  { %858 = dma.done.wait [#allocation3], 4096  }
  0x35   :  { %859 = vsyncadd [#allocation3], 4294963200 }
  0x36   :  { %860 = dma.done.wait [#allocation6], 6144  }
  0x37   :  { %861 = vsyncadd [#allocation6], 4294961152  ;;  %v110_v0 = vld [vmem:[#allocation5 + $0x80] sm:$0xff]  ;;  %v111_v1 = vld [vmem:[#allocation5 + $0x88] sm:$0xff] }
  0x38   :  { %v94_v2 = vld [vmem:[#allocation5] sm:$0xff]  ;;  %v666_v3 = vpack.c.bf16 %v111_v1, %v110_v0  ;;  %v95_v4 = vld [vmem:[#allocation5 + $0x8] sm:$0xff]  ;;  %v112_v5 = vld [vmem:[#allocation5 + $0x90] sm:$0xff] }
  0x39   :  { %v113_v6 = vld [vmem:[#allocation5 + $0x98] sm:$0xff]  ;;  %v668_v7 = vpack.c.bf16 %v95_v4, %v94_v2  ;;  %v96_v9 = vld [vmem:[#allocation5 + $0x10] sm:$0xff]  ;;  %v114_v11 = vld [vmem:[#allocation5 + $0xa0] sm:$0xff] }
  0x3a   :  { %v670_v8 = vpack.c.bf16 %v113_v6, %v112_v5  ;;  %v97_v10 = vld [vmem:[#allocation5 + $0x18] sm:$0xff]  ;;  %667 = vmatprep.subr.bf16.mxu0 %v666_v3  ;;  %v115_v12 = vld [vmem:[#allocation5 + $0xa8] sm:$0xff]  ;;  %v98_v15 = vld [vmem:[#allocation5 + $0x20] sm:$0xff] }
  0x3b   :  { %669 = vmatpush3.bf16.msra.mxu0 %v668_v7  ;;  %v672_v13 = vpack.c.bf16 %v97_v10, %v96_v9  ;;  %v674_v14 = vpack.c.bf16 %v115_v12, %v114_v11  ;;  %v99_v16 = vld [vmem:[#allocation5 + $0x28] sm:$0xff]  ;;  %v116_v17 = vld [vmem:[#allocation5 + $0xb0] sm:$0xff]  ;;  %v117_v18 = vld [vmem:[#allocation5 + $0xb8] sm:$0xff] }
  0x3c   :  { %671 = vmatprep.subr.bf16.mxu0 %v670_v8  ;;  %v676_v19 = vpack.c.bf16 %v99_v16, %v98_v15  ;;  %v678_v20 = vpack.c.bf16 %v117_v18, %v116_v17  ;;  %v100_v21 = vld [vmem:[#allocation5 + $0x30] sm:$0xff]  ;;  %v101_v22 = vld [vmem:[#allocation5 + $0x38] sm:$0xff]  ;;  %v118_v23 = vld [vmem:[#allocation5 + $0xc0] sm:$0xff] }
  0x3d   :  { %v119_v24 = vld [vmem:[#allocation5 + $0xc8] sm:$0xff]  ;;  %v680_v26 = vpack.c.bf16 %v101_v22, %v100_v21  ;;  %v102_v28 = vld [vmem:[#allocation5 + $0x40] sm:$0xff]  ;;  %v120_v30 = vld [vmem:[#allocation5 + $0xd0] sm:$0xff] }
  0x3e   :  { %v63_v25 = vld [vmem:[#allocation2 + $0x8] sm:$0xff]  ;;  %v682_v27 = vpack.c.bf16 %v119_v24, %v118_v23  ;;  %v121_v31 = vld [vmem:[#allocation5 + $0xd8] sm:$0xff]  ;;  %v104_v34 = vld [vmem:[#allocation5 + $0x50] sm:$0xff] }
  0x3f   :  { %673 = vmatpush3.bf16.msra.mxu0 %v672_v13  ;;  %197 = vmatprep.mubr.f32.mxu0 %v63_v25  ;;  %v103_v29 = vld [vmem:[#allocation5 + $0x48] sm:$0xff]  ;;  %v686_v33 = vpack.c.bf16 %v121_v31, %v120_v30  ;;  %v105_v35 = vld [vmem:[#allocation5 + $0x58] sm:$0xff]  ;;  %v122_v36 = vld [vmem:[#allocation5 + $0xe0] sm:$0xff] }
  0x40   :  { %675 = vmatprep.subr.bf16.mxu0 %v674_v14  ;;  %v684_v32 = vpack.c.bf16 %v103_v29, %v102_v28  ;;  %v123_v37 = vld [vmem:[#allocation5 + $0xe8] sm:$0xff]  ;;  %v688_v38 = vpack.c.bf16 %v105_v35, %v104_v34  ;;  %v106_v39 = vld [vmem:[#allocation5 + $0x60] sm:$0xff]  ;;  %v124_v42 = vld [vmem:[#allocation5 + $0xf0] sm:$0xff] }
  0x41   :  { %v107_v40 = vld [vmem:[#allocation5 + $0x68] sm:$0xff]  ;;  %v690_v41 = vpack.c.bf16 %v123_v37, %v122_v36  ;;  %v294_v43 = vld [vmem:[#allocation7] sm:$0xff]  ;;  %v125_v45 = vld [vmem:[#allocation5 + $0xf8] sm:$0xff] }
  0x42   :  { %v295_v44 = vld [vmem:[#allocation7 + $0x8] sm:$0xff]  ;;  %v296_v47 = vld [vmem:[#allocation7 + $0x10] sm:$0xff]  ;;  %v297_v48 = vld [vmem:[#allocation7 + $0x18] sm:$0xff]  ;;  %v692_v52 = vpack.c.bf16 %v107_v40, %v106_v39  ;;  %v694_v53 = vpack.c.bf16 %v125_v45, %v124_v42 }
  0x43   :  { %677 = vmatpush3.bf16.msra.mxu0 %v676_v19  ;;  %v698_v46 = vpack.c.bf16 %v295_v44, %v294_v43  ;;  %v702_v49 = vpack.c.bf16 %v297_v48, %v296_v47  ;;  %v298_v50 = vld [vmem:[#allocation7 + $0x20] sm:$0xff]  ;;  %v299_v51 = vld [vmem:[#allocation7 + $0x28] sm:$0xff]  ;;  %v108_v54 = vld [vmem:[#allocation5 + $0x70] sm:$0xff] }
  0x44   :  { %679 = vmatprep.subr.bf16.mxu0 %v678_v20  ;;  %v109_v55 = vld [vmem:[#allocation5 + $0x78] sm:$0xff]  ;;  %v706_v56 = vpack.c.bf16 %v299_v51, %v298_v50  ;;  %v62_v58 = vld [vmem:[#allocation2] sm:$0xff]  ;;  %v64_v60 = vld [vmem:[#allocation2 + $0x10] sm:$0xff] }
  0x45   :  { %699 = vmatprep.subr.bf16.mxu1 %v698_v46  ;;  %v696_v57 = vpack.c.bf16 %v109_v55, %v108_v54  ;;  %v65_v59 = vld [vmem:[#allocation2 + $0x18] sm:$0xff]  ;;  %v67_v61 = vld [vmem:[#allocation2 + $0x28] sm:$0xff]  ;;  %v66_v62 = vld [vmem:[#allocation2 + $0x20] sm:$0xff] }
  0x46   :  { %701 = vmatpush3.bf16.msra.mxu1 %v698_v46  ;;  %v69_v63 = vld [vmem:[#allocation2 + $0x38] sm:$0xff]  ;;  %v68_v0 = vld [vmem:[#allocation2 + $0x30] sm:$0xff]  ;;  %v71_v1 = vld [vmem:[#allocation2 + $0x48] sm:$0xff] }
  0x47   :  { %681 = vmatpush3.bf16.msra.mxu0 %v680_v26  ;;  %703 = vmatprep.subr.bf16.mxu1 %v702_v49  ;;  %v70_v2 = vld [vmem:[#allocation2 + $0x40] sm:$0xff]  ;;  %v73_v3 = vld [vmem:[#allocation2 + $0x58] sm:$0xff]  ;;  %v72_v4 = vld [vmem:[#allocation2 + $0x50] sm:$0xff] }
  0x48   :  { %683 = vmatprep.subr.bf16.mxu0 %v682_v27  ;;  %v75_v5 = vld [vmem:[#allocation2 + $0x68] sm:$0xff]  ;;  %v74_v6 = vld [vmem:[#allocation2 + $0x60] sm:$0xff]  ;;  %v77_v7 = vld [vmem:[#allocation2 + $0x78] sm:$0xff] }
  0x49   :  { %v76_v8 = vld [vmem:[#allocation2 + $0x70] sm:$0xff]  ;;  %v79_v9 = vld [vmem:[#allocation2 + $0x88] sm:$0xff]  ;;  %v78_v10 = vld [vmem:[#allocation2 + $0x80] sm:$0xff] }
  0x4a   :  { %705 = vmatpush3.bf16.msra.mxu1 %v702_v49  ;;  %v81_v11 = vld [vmem:[#allocation2 + $0x98] sm:$0xff]  ;;  %v80_v12 = vld [vmem:[#allocation2 + $0x90] sm:$0xff]  ;;  %v83_v13 = vld [vmem:[#allocation2 + $0xa8] sm:$0xff] }
  0x4b   :  { %685 = vmatpush3.bf16.msra.mxu0 %v684_v32  ;;  %707 = vmatprep.subr.bf16.mxu1 %v706_v56  ;;  %v82_v14 = vld [vmem:[#allocation2 + $0xa0] sm:$0xff]  ;;  %v85_v15 = vld [vmem:[#allocation2 + $0xb8] sm:$0xff]  ;;  %v84_v16 = vld [vmem:[#allocation2 + $0xb0] sm:$0xff] }
  0x4c   :  { %687 = vmatprep.subr.bf16.mxu0 %v686_v33  ;;  %v87_v17 = vld [vmem:[#allocation2 + $0xc8] sm:$0xff]  ;;  %v86_v18 = vld [vmem:[#allocation2 + $0xc0] sm:$0xff]  ;;  %v89_v19 = vld [vmem:[#allocation2 + $0xd8] sm:$0xff] }
  0x4d   :  { %v88_v20 = vld [vmem:[#allocation2 + $0xd0] sm:$0xff]  ;;  %v91_v21 = vld [vmem:[#allocation2 + $0xe8] sm:$0xff]  ;;  %v90_v22 = vld [vmem:[#allocation2 + $0xe0] sm:$0xff] }
  0x4e   :  { %709 = vmatpush3.bf16.msra.mxu1 %v706_v56  ;;  %v93_v23 = vld [vmem:[#allocation2 + $0xf8] sm:$0xff]  ;;  %v92_v24 = vld [vmem:[#allocation2 + $0xf0] sm:$0xff]  ;;  %v302_v28 = vld [vmem:[#allocation7 + $0x40] sm:$0xff] }
  0x4f   :  { %689 = vmatpush3.bf16.msra.mxu0 %v688_v38  ;;  %v300_v25 = vld [vmem:[#allocation7 + $0x30] sm:$0xff]  ;;  %v301_v26 = vld [vmem:[#allocation7 + $0x38] sm:$0xff]  ;;  %v303_v29 = vld [vmem:[#allocation7 + $0x48] sm:$0xff] }
  0x50   :  { %691 = vmatprep.subr.bf16.mxu0 %v690_v41  ;;  %v710_v27 = vpack.c.bf16 %v301_v26, %v300_v25  ;;  %v714_v30 = vpack.c.bf16 %v303_v29, %v302_v28  ;;  %v304_v31 = vld [vmem:[#allocation7 + $0x50] sm:$0xff]  ;;  %v305_v32 = vld [vmem:[#allocation7 + $0x58] sm:$0xff]  ;;  %v306_v34 = vld [vmem:[#allocation7 + $0x60] sm:$0xff] }
  0x51   :  { %v718_v33 = vpack.c.bf16 %v305_v32, %v304_v31  ;;  %v307_v35 = vld [vmem:[#allocation7 + $0x68] sm:$0xff]  ;;  %v308_v37 = vld [vmem:[#allocation7 + $0x70] sm:$0xff]  ;;  %v309_v38 = vld [vmem:[#allocation7 + $0x78] sm:$0xff] }
  0x52   :  { %711 = vmatprep.subr.bf16.mxu1 %v710_v27  ;;  %v722_v36 = vpack.c.bf16 %v307_v35, %v306_v34  ;;  %v726_v39 = vpack.c.bf16 %v309_v38, %v308_v37  ;;  %v947_v41 = vld [vmem:[%s985_s2] ss:$0 sm:$0xff] }
  0x53   :  { %693 = vmatpush3.bf16.msra.mxu0 %v692_v52  ;;  %713 = vmatpush3.bf16.msra.mxu1 %v710_v27 }
  0x54   :  { %695 = vmatprep.subr.bf16.mxu0 %v694_v53  ;;  %715 = vmatprep.subr.bf16.mxu1 %v714_v30 }
  0x57   :  { %697 = vmatpush3.bf16.msra.mxu0 %v696_v57  ;;  %717 = vmatpush3.bf16.msra.mxu1 %v714_v30 }
  0x58   :  { %719 = vmatprep.subr.bf16.mxu1 %v718_v33 }
  0x5a   :  { %198 = vmatmul.mubr.f32.vlgmr.msra.gmra.mrb[0].mxu0 %v62_v58 }
  0x5b   :  { %202 = vmatprep.mubr.f32.mxu0 %v65_v59  ;;  %721 = vmatpush3.bf16.msra.mxu1 %v718_v33 }
  0x5c   :  { %723 = vmatprep.subr.bf16.mxu1 %v722_v36 }
  0x5e   :  { %203 = vmatmul.mubr.f32.gmra.mrb[2].mxu0 %v64_v60 }
  0x5f   :  { %207 = vmatprep.mubr.f32.mxu0 %v67_v61  ;;  %725 = vmatpush3.bf16.msra.mxu1 %v722_v36 }
  0x60   :  { %727 = vmatprep.subr.bf16.mxu1 %v726_v39 }
  0x62   :  { %208 = vmatmul.mubr.f32.gmra.mrb[4].mxu0 %v66_v62 }
  0x63   :  { %212 = vmatprep.mubr.f32.mxu0 %v69_v63  ;;  %729 = vmatpush3.bf16.msra.mxu1 %v726_v39 }
  0x66   :  { %213 = vmatmul.mubr.f32.gmra.mrb[6].mxu0 %v68_v0 }
  0x67   :  { %217 = vmatprep.mubr.f32.mxu0 %v71_v1 }
  0x6a   :  { %218 = vmatmul.mubr.f32.gmra.mrb[8].mxu0 %v70_v2 }
  0x6b   :  { %222 = vmatprep.mubr.f32.mxu0 %v73_v3 }
  0x6e   :  { %223 = vmatmul.mubr.f32.gmra.mrb[10].mxu0 %v72_v4 }
  0x6f   :  { %227 = vmatprep.mubr.f32.mxu0 %v75_v5 }
  0x72   :  { %228 = vmatmul.mubr.f32.gmra.mrb[12].mxu0 %v74_v6 }
  0x73   :  { %232 = vmatprep.mubr.f32.mxu0 %v77_v7 }
  0x76   :  { %233 = vmatmul.mubr.f32.gmra.mrb[14].mxu0 %v76_v8 }
  0x77   :  { %237 = vmatprep.mubr.f32.mxu0 %v79_v9 }
  0x7a   :  { %238 = vmatmul.mubr.f32.gmra.mrb[16].mxu0 %v78_v10 }
  0x7b   :  { %242 = vmatprep.mubr.f32.mxu0 %v81_v11 }
  0x7e   :  { %243 = vmatmul.mubr.f32.gmra.mrb[18].mxu0 %v80_v12 }
  0x7f   :  { %247 = vmatprep.mubr.f32.mxu0 %v83_v13 }
  0x82   :  { %248 = vmatmul.mubr.f32.gmra.mrb[20].mxu0 %v82_v14 }
  0x83   :  { %252 = vmatprep.mubr.f32.mxu0 %v85_v15 }
  0x86   :  { %253 = vmatmul.mubr.f32.gmra.mrb[22].mxu0 %v84_v16 }
  0x87   :  { %257 = vmatprep.mubr.f32.mxu0 %v87_v17 }
  0x8a   :  { %258 = vmatmul.mubr.f32.gmra.mrb[24].mxu0 %v86_v18 }
  0x8b   :  { %262 = vmatprep.mubr.f32.mxu0 %v89_v19 }
  0x8e   :  { %263 = vmatmul.mubr.f32.gmra.mrb[26].mxu0 %v88_v20 }
  0x8f   :  { %267 = vmatprep.mubr.f32.mxu0 %v91_v21 }
  0x92   :  { %268 = vmatmul.mubr.f32.gmra.mrb[28].mxu0 %v90_v22 }
  0x93   :  { %272 = vmatprep.mubr.f32.mxu0 %v93_v23 }
  0x96   :  { %273 = vmatmul.mubr.f32.gmra.mrb[30].mxu0 %v92_v24 }
 0x12d   :  { %v530_v40 = vpop.f32.mrb[0].mxu0 }
 0x12e   :  { %v531_v42 = vpop.f32.mrb[1].mxu0 }
 0x12f   :  { %v532_v43 = vadd.f32 %v531_v42, %v530_v40 }
 0x131   :  { %v200_v44 = vadd.f32 %v532_v43, %v947_v41  ;;  %v533_v45 = vpop.f32.mrb[2].mxu0 }
 0x132   :  { %v534_v46 = vpop.f32.mrb[3].mxu0 }
 0x133   :  { %v535_v47 = vadd.f32 %v534_v46, %v533_v45  ;;  %738 = vtanh.f32 %v200_v44 }
 0x135   :  { %v205_v48 = vadd.f32 %v535_v47, %v947_v41  ;;  %v536_v49 = vpop.f32.mrb[4].mxu0 }
 0x136   :  { %v537_v50 = vpop.f32.mrb[5].mxu0 }
 0x137   :  { %740 = vtanh.f32 %v205_v48  ;;  %v538_v51 = vadd.f32 %v537_v50, %v536_v49 }
 0x139   :  { %v210_v52 = vadd.f32 %v538_v51, %v947_v41  ;;  %v539_v53 = vpop.f32.mrb[6].mxu0 }
 0x13a   :  { %v540_v54 = vpop.f32.mrb[7].mxu0 }
 0x13b   :  { %742 = vtanh.f32 %v210_v52  ;;  %v541_v55 = vadd.f32 %v540_v54, %v539_v53 }
 0x13d   :  { %v739_v56 = vpop.eup %738  ;;  %v215_v57 = vadd.f32 %v541_v55, %v947_v41  ;;  %v542_v58 = vpop.f32.mrb[8].mxu0 }
 0x13e   :  { %v543_v59 = vpop.f32.mrb[9].mxu0  ;;  %642 = vmatprep.mubr.f32.mxu1 %v739_v56 }
 0x13f   :  { %744 = vtanh.f32 %v215_v57  ;;  %v544_v60 = vadd.f32 %v543_v59, %v542_v58  ;;  %v497_v58 = vld [vmem:[%s987_s4] ss:$0 sm:$0xff]  ;;  %s871_s4 = smov [#allocation8]  }
 0x140   :  { %s483_s10 = sshll.u32 %s871_s4, 4  ;;  %s484_s10 = int_to_ptr.vmem [resolvable:$true] %s483_s10 }
 0x141   :  { %v741_v61 = vpop.eup %740  ;;  %v220_v62 = vadd.f32 %v544_v60, %v947_v41  ;;  %v545_v63 = vpop.f32.mrb[10].mxu0  ;;  %s836_s11 = scalar_lea.vmem %s484_s10, 2048  ;;  %p841_p11 = scmp.lt.s32.totalorder %s484_s10, %s484_s10 }
 0x142   :  { %v546_v0 = vpop.f32.mrb[11].mxu0  ;;  %643 = vmatmul.mubr.f32.vlgmr.msra.gmra.mrb[0].mxu1 %v741_v61  ;;  %p837_p10 = scmp.ne.s32.totalorder %s484_s10, %s836_s11  ;;  %p842_p12 = scmp.lt.s32.totalorder %s836_s11, %s836_s11 }
 0x143   :  { %746 = vtanh.f32 %v220_v62  ;;  %v547_v1 = vadd.f32 %v546_v0, %v545_v63 }
 0x144   :  { %p843_p13 = por %p842_p12, %p841_p11 }
 0x145   :  { %v743_v2 = vpop.eup %742  ;;  %v225_v3 = vadd.f32 %v547_v1, %v947_v41  ;;  %v548_v4 = vpop.f32.mrb[12].mxu0 }
 0x146   :  { %v549_v5 = vpop.f32.mrb[13].mxu0  ;;  %645 = vmatprep.mubr.f32.mxu1 %v743_v2  ;;  %p844_p0 = pnand %p843_p13, %p837_p10 }
 0x147   :  { %748 = vtanh.f32 %v225_v3  ;;  %v550_v6 = vadd.f32 %v549_v5, %v548_v4 }
 0x149   :  { %v745_v7 = vpop.eup %744  ;;  %v230_v8 = vadd.f32 %v550_v6, %v947_v41  ;;  %v551_v9 = vpop.f32.mrb[14].mxu0 }
 0x14a   :  { %v552_v10 = vpop.f32.mrb[15].mxu0  ;;  %646 = vmatmul.mubr.f32.gmra.mrb[2].mxu1 %v745_v7 }
 0x14b   :  { %750 = vtanh.f32 %v230_v8  ;;  %v553_v11 = vadd.f32 %v552_v10, %v551_v9 }
 0x14d   :  { %v747_v12 = vpop.eup %746  ;;  %v235_v13 = vadd.f32 %v553_v11, %v947_v41  ;;  %v554_v14 = vpop.f32.mrb[16].mxu0 }
 0x14e   :  { %v555_v15 = vpop.f32.mrb[17].mxu0  ;;  %648 = vmatprep.mubr.f32.mxu1 %v747_v12 }
 0x14f   :  { %752 = vtanh.f32 %v235_v13  ;;  %v556_v16 = vadd.f32 %v555_v15, %v554_v14 }
 0x151   :  { %v749_v17 = vpop.eup %748  ;;  %v240_v18 = vadd.f32 %v556_v16, %v947_v41  ;;  %v557_v19 = vpop.f32.mrb[18].mxu0 }
 0x152   :  { %v558_v20 = vpop.f32.mrb[19].mxu0  ;;  %649 = vmatmul.mubr.f32.gmra.mrb[4].mxu1 %v749_v17 }
 0x153   :  { %754 = vtanh.f32 %v240_v18  ;;  %v559_v21 = vadd.f32 %v558_v20, %v557_v19 }
 0x155   :  { %v751_v22 = vpop.eup %750  ;;  %v245_v23 = vadd.f32 %v559_v21, %v947_v41  ;;  %v560_v24 = vpop.f32.mrb[20].mxu0 }
 0x156   :  { %v561_v25 = vpop.f32.mrb[21].mxu0  ;;  %651 = vmatprep.mubr.f32.mxu1 %v751_v22 }
 0x157   :  { %756 = vtanh.f32 %v245_v23  ;;  %v562_v26 = vadd.f32 %v561_v25, %v560_v24 }
 0x159   :  { %v753_v27 = vpop.eup %752  ;;  %v250_v28 = vadd.f32 %v562_v26, %v947_v41  ;;  %v563_v29 = vpop.f32.mrb[22].mxu0 }
 0x15a   :  { %v564_v30 = vpop.f32.mrb[23].mxu0  ;;  %652 = vmatmul.mubr.f32.gmra.mrb[6].mxu1 %v753_v27 }
 0x15b   :  { %758 = vtanh.f32 %v250_v28  ;;  %v565_v31 = vadd.f32 %v564_v30, %v563_v29 }
 0x15d   :  { %v755_v32 = vpop.eup %754  ;;  %v255_v33 = vadd.f32 %v565_v31, %v947_v41  ;;  %v566_v34 = vpop.f32.mrb[24].mxu0 }
 0x15e   :  { %v567_v35 = vpop.f32.mrb[25].mxu0  ;;  %654 = vmatprep.mubr.f32.mxu1 %v755_v32 }
 0x15f   :  { %760 = vtanh.f32 %v255_v33  ;;  %v568_v36 = vadd.f32 %v567_v35, %v566_v34 }
 0x161   :  { %v757_v37 = vpop.eup %756  ;;  %v260_v38 = vadd.f32 %v568_v36, %v947_v41  ;;  %v569_v39 = vpop.f32.mrb[26].mxu0 }
 0x162   :  { %v570_v40 = vpop.f32.mrb[27].mxu0  ;;  %655 = vmatmul.mubr.f32.gmra.mrb[8].mxu1 %v757_v37 }
 0x163   :  { %762 = vtanh.f32 %v260_v38  ;;  %v571_v42 = vadd.f32 %v570_v40, %v569_v39 }
 0x165   :  { %v759_v43 = vpop.eup %758  ;;  %v265_v44 = vadd.f32 %v571_v42, %v947_v41  ;;  %v572_v45 = vpop.f32.mrb[28].mxu0 }
 0x166   :  { %v573_v46 = vpop.f32.mrb[29].mxu0  ;;  %657 = vmatprep.mubr.f32.mxu1 %v759_v43 }
 0x167   :  { %764 = vtanh.f32 %v265_v44  ;;  %v574_v47 = vadd.f32 %v573_v46, %v572_v45 }
 0x169   :  { %v761_v48 = vpop.eup %760  ;;  %v270_v49 = vadd.f32 %v574_v47, %v947_v41  ;;  %v575_v50 = vpop.f32.mrb[30].mxu0 }
 0x16a   :  { %v576_v51 = vpop.f32.mrb[31].mxu0  ;;  %658 = vmatmul.mubr.f32.gmra.mrb[10].mxu1 %v761_v48 }
 0x16b   :  { %766 = vtanh.f32 %v270_v49  ;;  %v577_v52 = vadd.f32 %v576_v51, %v575_v50 }
 0x16d   :  { %v763_v53 = vpop.eup %762  ;;  %v275_v54 = vadd.f32 %v577_v52, %v947_v41 }
 0x16e   :  { %660 = vmatprep.mubr.f32.mxu1 %v763_v53 }
 0x16f   :  { %768 = vtanh.f32 %v275_v54 }
 0x171   :  { %v765_v55 = vpop.eup %764 }
 0x172   :  { %661 = vmatmul.mubr.f32.gmra.mrb[12].mxu1 %v765_v55 }
 0x175   :  { %v767_v56 = vpop.eup %766 }
 0x176   :  { %663 = vmatprep.mubr.f32.mxu1 %v767_v56 }
 0x179   :  { %v769_v57 = vpop.eup %768 }
 0x17a   :  { %664 = vmatmul.mubr.f32.gmra.mrb[14].mxu1 %v769_v57 }
 0x215   :  { %v644_v59 = vpop.f32.mrb[0].mxu1 }
 0x216   :  { %v389_v60 = vadd.f32 %v644_v59, %v497_v58  ;;  %v383_v61 = vpop.f32.mrb[1].mxu1 }
 0x217   :  { %v384_v62 = vadd.f32 %v497_v58, %v383_v61 }
 0x218   :  { %463 = vst [vmem:[#allocation8 + $0x8] sm:$0xff] %v389_v60 }
 0x219   :  { %462 = vst [vmem:[#allocation8] sm:$0xff] %v384_v62 }
 0x21d   :  { %v647_v63 = vpop.f32.mrb[2].mxu1 }
 0x21e   :  { %v399_v41 = vadd.f32 %v647_v63, %v497_v58  ;;  %v393_v0 = vpop.f32.mrb[3].mxu1 }
 0x21f   :  { %v394_v1 = vadd.f32 %v497_v58, %v393_v0 }
 0x220   :  { %465 = vst [vmem:[#allocation8 + $0x18] sm:$0xff] %v399_v41 }
 0x221   :  { %464 = vst [vmem:[#allocation8 + $0x10] sm:$0xff] %v394_v1 }
 0x225   :  { %v650_v2 = vpop.f32.mrb[4].mxu1 }
 0x226   :  { %v409_v3 = vadd.f32 %v650_v2, %v497_v58  ;;  %v403_v4 = vpop.f32.mrb[5].mxu1 }
 0x227   :  { %v404_v5 = vadd.f32 %v497_v58, %v403_v4 }
 0x228   :  { %467 = vst [vmem:[#allocation8 + $0x28] sm:$0xff] %v409_v3 }
 0x229   :  { %466 = vst [vmem:[#allocation8 + $0x20] sm:$0xff] %v404_v5 }
 0x22d   :  { %v653_v6 = vpop.f32.mrb[6].mxu1 }
 0x22e   :  { %v419_v7 = vadd.f32 %v653_v6, %v497_v58  ;;  %v413_v8 = vpop.f32.mrb[7].mxu1 }
 0x22f   :  { %v414_v9 = vadd.f32 %v497_v58, %v413_v8 }
 0x230   :  { %469 = vst [vmem:[#allocation8 + $0x38] sm:$0xff] %v419_v7 }
 0x231   :  { %468 = vst [vmem:[#allocation8 + $0x30] sm:$0xff] %v414_v9 }
 0x235   :  { %v656_v10 = vpop.f32.mrb[8].mxu1 }
 0x236   :  { %v429_v11 = vadd.f32 %v656_v10, %v497_v58  ;;  %v423_v12 = vpop.f32.mrb[9].mxu1 }
 0x237   :  { %v424_v13 = vadd.f32 %v497_v58, %v423_v12 }
 0x238   :  { %471 = vst [vmem:[#allocation8 + $0x48] sm:$0xff] %v429_v11 }
 0x239   :  { %470 = vst [vmem:[#allocation8 + $0x40] sm:$0xff] %v424_v13 }
 0x23d   :  { %v659_v14 = vpop.f32.mrb[10].mxu1 }
 0x23e   :  { %v439_v15 = vadd.f32 %v659_v14, %v497_v58  ;;  %v433_v16 = vpop.f32.mrb[11].mxu1 }
 0x23f   :  { %v434_v17 = vadd.f32 %v497_v58, %v433_v16 }
 0x240   :  { %473 = vst [vmem:[#allocation8 + $0x58] sm:$0xff] %v439_v15 }
 0x241   :  { %472 = vst [vmem:[#allocation8 + $0x50] sm:$0xff] %v434_v17 }
 0x245   :  { %v662_v18 = vpop.f32.mrb[12].mxu1 }
 0x246   :  { %v449_v19 = vadd.f32 %v662_v18, %v497_v58  ;;  %v443_v20 = vpop.f32.mrb[13].mxu1 }
 0x247   :  { %v444_v21 = vadd.f32 %v497_v58, %v443_v20 }
 0x248   :  { %475 = vst [vmem:[#allocation8 + $0x68] sm:$0xff] %v449_v19 }
 0x249   :  { %474 = vst [vmem:[#allocation8 + $0x60] sm:$0xff] %v444_v21 }
 0x24d   :  { %v665_v22 = vpop.f32.mrb[14].mxu1 }
 0x24e   :  { %v459_v23 = vadd.f32 %v665_v22, %v497_v58  ;;  %v453_v24 = vpop.f32.mrb[15].mxu1 }
 0x24f   :  { %v454_v25 = vadd.f32 %v497_v58, %v453_v24 }
 0x250   :  { %477 = vst [vmem:[#allocation8 + $0x78] sm:$0xff] %v459_v23 }
 0x251   :  { %476 = vst [vmem:[#allocation8 + $0x70] sm:$0xff] %v454_v25 }
 0x252   :  { %847 = shalt.err (!%p844_p0)
}
 0x253   :  { %s848_s14 = scalar_lea.hbm %s988_s5, 2048 }
 0x254   :  { %p849_p1 = scmp.ne.s32.totalorder %s988_s5, %s848_s14  ;;  %p852_p2 = scmp.lt.u32.totalorder %s848_s14, %s988_s5 }
 0x256   :  { %p854_p3 = pnand %p852_p2, %p849_p1 }
 0x258   :  { %857 = shalt.err (!%p854_p3)
}
 0x259   :  { %489 = dma.vmem_to_hbm [thread:$0]  %s484_s10, 2048, %s988_s5, [#allocation4], %s865_s28, %s865_s28, %s866_s29  }
 0x25a   :  { %862 = dma.done.wait [#allocation4], 2048  }
 0x25b   :  { %863 = vsyncadd [#allocation4], 4294965248 }
 0x25c   :  { %493 = vsyncpa [#allocation3], 1 }
 0x25d   :  { %494 = vsyncpa [#allocation6], 1 }
 0x25e   :  { %495 = vsyncpa [#allocation4], 1 }

</bundles_post_ra>
